<compile_context>
chip_gen: v5e
topology: v5e:2x2
jax: 0.10.0
libtpu: 0.0.40
codegen_flags: <defaults>
</compile_context>

<pallas_src>
import math

import jax
import jax.numpy as jnp
from jax.experimental import pallas as pl
from jax.experimental.pallas import tpu as pltpu


# ---------------------------------------------------------------------------
# Pallas kernel: out = tanh(x @ W + b), single shot per (N-block, row-block)
# ---------------------------------------------------------------------------
def pooler_kernel(x_ref, w_ref, b_ref, out_ref):
    # x_ref:   [tm, K]  bf16   (first-token activations, rows padded to 8)
    # w_ref:   [K, tn]  bf16   (pre-transposed [in, out] weight tile)
    # b_ref:   [1, tn]  f32
    # out_ref: [tm, tn] f32
    out_ref[...] = jnp.tanh(
        jnp.dot(x_ref[...], w_ref[...], preferred_element_type=jnp.float32)
        + b_ref[...]
    )


# ---------------------------------------------------------------------------
# Helpers
# ---------------------------------------------------------------------------
def _round_up(x, m):
    return ((x + m - 1) // m) * m


def _pick_tn(n):
    # Prefer >=2 lane-aligned (multiple-of-128) N blocks so v7x's two
    # TensorCores can each take half the weight stream; cap block at 512.
    for cand in (512, 384, 256, 128):
        if n % cand == 0 and n // cand >= 2:
            return cand
    return n  # single full-extent block (e.g. small H in the toy test)


def prepare_pooler_params(dense_w, dense_b):
    """One-time parameter prep (at init / weight load, NOT per forward):
    transpose PyTorch [out, in] weight to [in, out] and cast to bf16 for the
    MXU; bias stays f32 as a [1, H] row."""
    w_kn = jnp.asarray(dense_w).T.astype(jnp.bfloat16)          # [H_in, H_out]
    b_row = jnp.asarray(dense_b).astype(jnp.float32).reshape(1, -1)
    return w_kn, b_row


# ---------------------------------------------------------------------------
# Wrapper (hot path): no weight work, only a tiny row pad / bf16 cast of x.
# ---------------------------------------------------------------------------
def roberta_pooler(hidden_states, w_kn_bf16, bias_row_f32):
    """hidden_states: [B, S, H]; w_kn_bf16: [H, H] ([in, out], bf16, prepared);
    bias_row_f32: [1, H] f32 (prepared)."""
    B, S, H = hidden_states.shape
    K, N = w_kn_bf16.shape  # = (H, H)

    # Layout glue: the nn.Module's hidden_states[:, 0] first-token gather.
    x = hidden_states[:, 0, :]  # [B, H]

    # One row tile covering all rows when possible -> W streamed exactly once.
    if B <= 1024:
        bp = _round_up(B, 8)
        tm = bp
    else:
        tm = 1024
        bp = _round_up(B, tm)
    x_p = jnp.pad(x, ((0, bp - B), (0, 0))).astype(jnp.bfloat16)

    tn = _pick_tn(N)
    # N outermost, rows innermost: each weight block is DMA'd exactly once.
    grid = (N // tn, bp // tm)

    out_padded = pl.pallas_call(
        pooler_kernel,
        out_shape=jax.ShapeDtypeStruct((bp, N), jnp.float32),
        grid=grid,
        in_specs=[
            pl.BlockSpec((tm, K), lambda j, i: (i, 0)),   # x rows (full K)
            pl.BlockSpec((K, tn), lambda j, i: (0, j)),   # W [in, out] tile
            pl.BlockSpec((1, tn), lambda j, i: (0, j)),   # bias row tile
        ],
        out_specs=pl.BlockSpec((tm, tn), lambda j, i: (i, j)),
        compiler_params=pltpu.CompilerParams(
            dimension_semantics=("parallel", "parallel"),
        ),
        cost_estimate=pl.CostEstimate(
            flops=2 * bp * N * K,
            transcendentals=bp * N,
            bytes_accessed=bp * K * 2 + K * N * 2 + N * 4 + bp * N * 4,
        ),
    )(x_p, w_kn_bf16, bias_row_f32)

    return out_padded[:B, :]


# ---------------------------------------------------------------------------
# Deterministic parameter init (matches LinearActivation.reset_parameters:
# kaiming_uniform_(a=sqrt(5)) -> U(-1/sqrt(fan_in), 1/sqrt(fan_in)) for both
# weight and bias).
# ---------------------------------------------------------------------------
def init_params(key, hidden_size):
    kw, kb = jax.random.split(key)
    bound = 1.0 / math.sqrt(hidden_size)
    dense_w = jax.random.uniform(
        kw, (hidden_size, hidden_size), jnp.float32, -bound, bound
    )
    dense_b = jax.random.uniform(kb, (hidden_size,), jnp.float32, -bound, bound)
    return dense_w, dense_b


if __name__ == "__main__":
    B, S, H = 2, 8, 32

    key = jax.random.PRNGKey(0)
    k_hidden, k_params = jax.random.split(key)

    hidden_states = jax.random.normal(k_hidden, (B, S, H), jnp.float32)
    dense_w, dense_b = init_params(k_params, H)

    # One-time parameter prep (outside the hot path).
    w_kn, b_row = prepare_pooler_params(dense_w, dense_b)

    pooled = roberta_pooler(hidden_states, w_kn, b_row)
    jax.block_until_ready(pooled)

    assert pooled.shape == (B, H)

    # Reference (pure JAX, f32): tanh(first_token @ W^T + b).  bf16 MXU
    # operands introduce ~1e-2 rounding, so compare with a loose tolerance.
    ref = jnp.tanh(hidden_states[:, 0, :] @ dense_w.T + dense_b)
    assert jnp.allclose(pooled, ref, atol=2e-2, rtol=2e-2), (
        float(jnp.max(jnp.abs(pooled - ref)))
    )

    print("KERNEL_OK")
</pallas_src>

<mosaic_0001>
module attributes {stable_mosaic.version = 11 : i64} {
  func.func @pooler_kernel(%arg0: i32, %arg1: i32, %arg2: memref<8x32xbf16, #tpu.memory_space<vmem>>, %arg3: memref<32x32xbf16, #tpu.memory_space<vmem>>, %arg4: memref<1x32xf32, #tpu.memory_space<vmem>>, %arg5: memref<8x32xf32, #tpu.memory_space<vmem>>) attributes {dimension_semantics = [#tpu.dimension_semantics<parallel>, #tpu.dimension_semantics<parallel>], iteration_bounds = array<i64: 1, 1>, scalar_prefetch = 0 : i64, scratch_operands = 0 : i64, tpu.core_type = #tpu.core_type<tc>, window_params = [{transform_indices = @transform_0, window_bounds = array<i64: 8, 32>}, {transform_indices = @transform_1, window_bounds = array<i64: 32, 32>}, {transform_indices = @transform_2, window_bounds = array<i64: 1, 32>}, {transform_indices = @transform_3, window_bounds = array<i64: 8, 32>}]} {
    %c0 = arith.constant 0 : index
    %c0_0 = arith.constant 0 : index
    %0 = vector.load %arg2[%c0, %c0_0] : memref<8x32xbf16, #tpu.memory_space<vmem>>, vector<8x32xbf16>
    %c0_1 = arith.constant 0 : index
    %c0_2 = arith.constant 0 : index
    %1 = vector.load %arg3[%c0_1, %c0_2] : memref<32x32xbf16, #tpu.memory_space<vmem>>, vector<32x32xbf16>
    %cst = arith.constant dense<0.000000e+00> : vector<8x32xf32>
    %2 = tpu.matmul %0, %1, %cst {dimension_numbers = #tpu.dot_dimension_numbers<[1], [0], [0], [1], [0, 0, 1, 1], [], []>} : vector<8x32xbf16>, vector<32x32xbf16>, vector<8x32xf32> -> vector<8x32xf32>
    %c0_3 = arith.constant 0 : index
    %c0_4 = arith.constant 0 : index
    %3 = vector.load %arg4[%c0_3, %c0_4] : memref<1x32xf32, #tpu.memory_space<vmem>>, vector<1x32xf32>
    %4 = vector.broadcast %3 : vector<1x32xf32> to vector<8x32xf32>
    %5 = arith.addf %2, %4 : vector<8x32xf32>
    %6 = math.tanh %5 : vector<8x32xf32>
    %c0_5 = arith.constant 0 : index
    %c0_6 = arith.constant 0 : index
    %7 = vector.load %arg5[%c0_5, %c0_6] : memref<8x32xf32, #tpu.memory_space<vmem>>, vector<8x32xf32>
    tpu.vector_store %arg5[%c0_5, %c0_6], %6 {strides = array<i32>} : memref<8x32xf32, #tpu.memory_space<vmem>>, vector<8x32xf32>,
    return
  }
  func.func @transform_0(%arg0: i32, %arg1: i32) -> (i32, i32) {
    %c0_i32 = arith.constant 0 : i32
    %c0_i32_0 = arith.constant 0 : i32
    return %arg1, %c0_i32 : i32, i32
  }
  func.func @transform_1(%arg0: i32, %arg1: i32) -> (i32, i32) {
    %c0_i32 = arith.constant 0 : i32
    %c0_i32_0 = arith.constant 0 : i32
    return %c0_i32, %arg0 : i32, i32
  }
  func.func @transform_2(%arg0: i32, %arg1: i32) -> (i32, i32) {
    %c0_i32 = arith.constant 0 : i32
    %c0_i32_0 = arith.constant 0 : i32
    return %c0_i32, %arg0 : i32, i32
  }
  func.func @transform_3(%arg0: i32, %arg1: i32) -> (i32, i32) {
    %c0_i32 = arith.constant 0 : i32
    return %arg1, %arg0 : i32, i32
  }
}

</mosaic_0001>

<bundles_post_ra>
// kernel: tpu_custom_call.1
= control target key start
LH: loop header
LB: loop body
LE: loop exit
PB: predicated region body
PF: predicated region fallthrough
CT: control target
= control target key end

     0   :  { %8 = vsyncpa [#allocation3], 0  ;;  %s238_s0 = inlined_call_operand.hbm [shape: bf16[8,32], index: 0, kind: input, shape index: {}]   ;;  %s239_s1 = inlined_call_operand.hbm [shape: bf16[32,32], index: 1, kind: input, shape index: {}]   ;;  %s240_s2 = inlined_call_operand.vmem [shape: f32[1,32], index: 2, kind: input, shape index: {}]   ;;  %s241_s3 = inlined_call_operand.hbm [shape: f32[8,32], index: 3, kind: output, shape index: {}]  }
   0x1   :  { %9 = vsyncpa [#allocation6], 0 }
   0x2   :  { %10 = vsyncpa [#allocation4], 0  ;;  %s16_s14 = sshll.u32 %s238_s0, 4  ;;  %s201_s15 = smov [#allocation2]   ;;  %s17_s14 = int_to_ptr.hbm [resolvable:$true] %s16_s14 }
   0x3   :  { %s18_s16 = sshll.u32 %s201_s15, 4  ;;  %s26_s19 = sshll.u32 %s239_s1, 4  ;;  %s19_s16 = int_to_ptr.vmem [resolvable:$true] %s18_s16  ;;  %s27_s19 = int_to_ptr.hbm [resolvable:$true] %s26_s19 }
   0x4   :  { %21 = dma.hbm_to_vmem [thread:$0]  %s17_s14, 64, %s19_s16, [#allocation3]  }
   0x5   :  { %s202_s20 = smov [#allocation5]   ;;  %s203_s22 = smov 64  }
   0x6   :  { %s28_s21 = sshll.u32 %s202_s20, 4  ;;  %s204_s23 = smov 4   ;;  %s29_s21 = int_to_ptr.vmem [resolvable:$true] %s28_s21 }
   0x7   :  { %34 = dma.hbm_to_vmem [thread:$0]  %s27_s19, 256, %s29_s21, [#allocation6], %s203_s22, %s203_s22, %s204_s23  }
   0x8   :  { %195 = dma.done.wait [#allocation3], 64  }
   0x9   :  { %196 = vsyncadd [#allocation3], 4294967232 }
   0xa   :  { %197 = dma.done.wait [#allocation6], 256  }
   0xb   :  { %198 = vsyncadd [#allocation6], 4294967040  ;;  %v114_v0 = vld [vmem:[#allocation5 + $0x8] sm:$0xff]  ;;  %v113_v1 = vld [vmem:[#allocation5] sm:$0xff]  ;;  %vm67_vm0 = vcmask 261120   ;;  %s205_s24 = smov [#allocation7]  }
   0xc   :  { %77 = vmatpush.bf16.msra.mxu0 %v114_v0  ;;  %v46_v2 = vld [vmem:[#allocation2] sm:$0xf]  ;;  %s91_s25 = sshll.u32 %s205_s24, 4  ;;  %s93_s28 = sshll.u32 %s241_s3, 4  ;;  %s92_s25 = int_to_ptr.vmem [resolvable:$true] %s91_s25  ;;  %s94_s28 = int_to_ptr.hbm [resolvable:$true] %s93_s28 }
   0xd   :  { %v120_v3 = vld [vmem:[%s240_s2] ss:$0 sm:$0xff] }
  0x10   :  { %78 = vmatpush.bf16.msra.mxu0 %v113_v1 }
  0x13   :  { %112 = vmatmul.msk.bf16.vlgmr.msra.gmra.mxu0 %vm67_vm0, %v46_v2 }
  0x90   :  { %v80_v4 = vpop.f32.mrf.mxu0 }
  0x91   :  { %v81_v5 = vadd.f32 %v120_v3, %v80_v4 }
  0x93   :  { %121 = vtanh.f32 %v81_v5 }
  0x98   :  { %v82_v6 = vpop.f32.mrf.mxu0 }
  0x99   :  { %v122_v7 = vpop.eup %121 }
  0x9a   :  { %85 = vst.msk [vmem:[#allocation7] sm:$0xff] %vm67_vm0, %v122_v7 }
  0x9b   :  { %96 = dma.vmem_to_hbm [thread:$0]  %s92_s25, 128, %s94_s28, [#allocation4]  }
  0x9c   :  { %199 = dma.done.wait [#allocation4], 128  }
  0x9d   :  { %200 = vsyncadd [#allocation4], 4294967168 }
  0x9e   :  { %101 = vsyncpa [#allocation3], 1 }
  0x9f   :  { %102 = vsyncpa [#allocation6], 1 }
  0xa0   :  { %103 = vsyncpa [#allocation4], 1 }

</bundles_post_ra>
